<compile_context>
chip_gen: v7x
topology: tpu7x:2x2x1
jax: 0.10.0
libtpu: 0.0.40
codegen_flags: <defaults>
</compile_context>

<pallas_src>
import jax
import jax.numpy as jnp
from jax.experimental import pallas as pl
from jax.experimental.pallas import tpu as pltpu


def _round_up(x, m):
    return ((x + m - 1) // m) * m


def _concat_conv1d_kernel(x_ref, w_ref, b_ref, o_ref):
    # x_ref: (C_pad, TB*L_blk)  channel-major input, batch folded into lanes
    # w_ref: (C_out, K*C_pad)   flattened conv weight, tap-major
    # b_ref: (C_out, 1)         effective bias (time channel folded in), f32
    # o_ref: (C_out, TB*L_blk)  conv output; per-sample tail columns are junk
    #                           (cross-sample taps) and are discarded in the
    #                           wrapper.
    c_pad = x_ref.shape[0]
    k_taps = w_ref.shape[1] // c_pad

    x = x_ref[...]                                          # (C_pad, W)
    # im2col with wrap: piece_k[c, j] = x[c, (j + k) % W].  Only K-1 lane
    # shifts per grid step; wrapped columns land in the discarded tail.
    pieces = [x]
    for k in range(1, k_taps):
        pieces.append(jnp.concatenate([x[:, k:], x[:, :k]], axis=1))
    patches = jnp.concatenate(pieces, axis=0)               # (K*C_pad, W)

    # Single MXU contraction over K*C_pad with a long N = TB*L_blk lane stream.
    y = jnp.dot(w_ref[...], patches,
                preferred_element_type=jnp.float32)         # (C_out, W) f32
    o_ref[...] = (y + b_ref[...]).astype(o_ref.dtype)       # lane-dense store


def _choose_blocking(B, L, bytes_per_col, *, target_bytes=1 << 20,
                     min_block_bytes=64 << 10, min_grid=4):
    """Pick (TB, L_blk).

    The x/out blocks are (C, TB*L_blk); the last block dim must either equal
    the full array dim (TB == B) or be a multiple of 128.  TB is sized from a
    ~1 MiB byte budget (the kernel is memory-bound); we keep >= min_grid grid
    steps for multi-TensorCore chips only when that does not shrink blocks
    below min_block_bytes.  L is padded to a 128 multiple only when alignment
    would otherwise force an oversized full-batch block.
    """
    divisors = [d for d in range(1, B + 1) if B % d == 0]
    tb, l_blk = B, L
    for l_blk in (L, _round_up(L, 128)):
        cands = [d for d in divisors if d == B or (d * l_blk) % 128 == 0]
        fits = [d for d in cands if d * l_blk * bytes_per_col <= target_bytes]
        tb = max(fits) if fits else min(cands)
        if (not fits and l_blk == L
                and tb * l_blk * bytes_per_col > 4 * target_bytes):
            continue  # alignment forced an oversized block; retry padded L
        want = min(min_grid, B)
        if B // tb < want:
            better = [d for d in cands if B // d >= want
                      and d * l_blk * bytes_per_col >= min_block_bytes]
            if better:
                tb = max(better)
        return tb, l_blk
    return tb, l_blk


def concat_conv1d(t, x_ncl, weight_oik, bias_o, *,
                  kernel_size=3, stride=1, padding=0, block_b=None):
    """Forward pass of ConcatConv1d (Conv1d branch).

    Args:
      t:          scalar time.
      x_ncl:      (B, C_in, L)        -- PyTorch NCL layout.
      weight_oik: (C_out, C_in+1, K)  -- PyTorch Conv1d weight layout.
      bias_o:     (C_out,)
    Returns:
      (B, C_out, L_out) with L_out = L - K + 1
    """
    assert stride == 1 and padding == 0, "defaults of the reference module"
    B, C_in, L = x_ncl.shape
    C_out, C_in1, K = weight_oik.shape
    assert C_in1 == C_in + 1 and K == kernel_size
    L_out = L - K + 1
    assert L_out >= 1

    dtype = x_ncl.dtype
    itemsize = jnp.dtype(dtype).itemsize

    # --- fold the constant time channel into the bias (valid for padding=0) --
    t32 = jnp.asarray(t, jnp.float32)
    b_eff = (bias_o.astype(jnp.float32)
             + t32 * weight_oik[:, 0, :].astype(jnp.float32).sum(-1))
    b_eff = b_eff.reshape(C_out, 1)

    # --- channel padding to a sublane multiple (8) ---------------------------
    C_pad = _round_up(C_in, 8)

    # --- batch block / per-sample width selection ----------------------------
    if block_b is not None:
        assert B % block_b == 0, "block_b must divide the batch size"
        TB = block_b
        L_blk = L if (TB == B or (TB * L) % 128 == 0) else _round_up(L, 128)
    else:
        TB, L_blk = _choose_blocking(B, L, C_pad * itemsize)
    grid_b = B // TB

    # --- wrapper-side layout plumbing (cheap XLA) -----------------------------
    x_p = x_ncl
    if C_pad != C_in:
        x_p = jnp.pad(x_p, ((0, 0), (0, C_pad - C_in), (0, 0)))
    if L_blk != L:
        x_p = jnp.pad(x_p, ((0, 0), (0, 0), (0, L_blk - L)))
    x2 = jnp.transpose(x_p, (1, 0, 2)).reshape(C_pad, B * L_blk)   # (C_pad, B*L_blk)

    # flatten x-channel taps tap-major: w_flat[o, k*C_pad + c] = weight[o, 1+c, k]
    w_x = jnp.transpose(weight_oik[:, 1:, :], (0, 2, 1))           # (C_out, K, C_in)
    if C_pad != C_in:
        w_x = jnp.pad(w_x, ((0, 0), (0, 0), (0, C_pad - C_in)))
    w_flat = w_x.reshape(C_out, K * C_pad).astype(dtype)

    # --- VMEM budget for the chosen block (double-buffered I/O + temporaries) -
    x_blk_bytes = C_pad * TB * L_blk * itemsize
    o_blk_bytes = C_out * TB * L_blk * itemsize
    need = (2 * (x_blk_bytes + o_blk_bytes) + (K + 1) * x_blk_bytes
            + C_out * TB * L_blk * 4 + (1 << 20))
    vmem_limit = int(min(max(2 * need, 32 << 20), 64 << 20))

    cost = pl.CostEstimate(
        flops=2 * B * C_out * L_blk * K * C_pad,
        transcendentals=0,
        bytes_accessed=((x2.size + w_flat.size) * itemsize
                        + b_eff.size * 4 + C_out * B * L_blk * itemsize))

    # --- hot path: Pallas kernel, grid over batch blocks ----------------------
    out_flat = pl.pallas_call(
        _concat_conv1d_kernel,
        out_shape=jax.ShapeDtypeStruct((C_out, B * L_blk), dtype),
        grid_spec=pltpu.PrefetchScalarGridSpec(
            num_scalar_prefetch=0,
            grid=(grid_b,),
            in_specs=[
                pl.BlockSpec((C_pad, TB * L_blk), lambda b: (0, b)),
                pl.BlockSpec((C_out, K * C_pad), lambda b: (0, 0)),
                pl.BlockSpec((C_out, 1), lambda b: (0, 0)),
            ],
            out_specs=pl.BlockSpec((C_out, TB * L_blk), lambda b: (0, b)),
        ),
        compiler_params=pltpu.CompilerParams(
            dimension_semantics=("parallel",),
            vmem_limit_bytes=vmem_limit),
        cost_estimate=cost,
    )(x2, w_flat, b_eff)

    # drop per-sample junk tail columns; back to PyTorch NCL layout
    out = out_flat.reshape(C_out, B, L_blk)[:, :, :L_out]           # (C_out, B, L_out)
    return jnp.transpose(out, (1, 0, 2))                            # (B, C_out, L_out)


if __name__ == "__main__":
    # small shapes consistent with the module
    B, C_in, C_out, L, K = 2, 4, 4, 16, 3

    key = jax.random.PRNGKey(0)
    kx, kw, kb = jax.random.split(key, 3)

    x = jax.random.normal(kx, (B, C_in, L), dtype=jnp.float32)
    # nn.Conv1d parameter shapes: weight (C_out, C_in+1, K), bias (C_out,)
    weight = 0.1 * jax.random.normal(kw, (C_out, C_in + 1, K), dtype=jnp.float32)
    bias = 0.1 * jax.random.normal(kb, (C_out,), dtype=jnp.float32)
    t = jnp.float32(0.37)

    y = concat_conv1d(t, x, weight, bias)
    jax.block_until_ready(y)

    # reference check with lax.conv (same semantics as torch.nn.Conv1d)
    tt = jnp.ones((B, 1, L), dtype=x.dtype) * t
    ttx = jnp.concatenate([tt, x], axis=1)                          # (B, C_in+1, L)
    y_ref = jax.lax.conv_general_dilated(
        ttx, weight, window_strides=(1,), padding="VALID",
        dimension_numbers=("NCH", "OIH", "NCH"),
    ) + bias[None, :, None]

    assert y.shape == (B, C_out, L - K + 1)
    assert jnp.allclose(y, y_ref, atol=1e-5, rtol=1e-5)
    print("KERNEL_OK")
</pallas_src>

<mosaic_0001>
module attributes {stable_mosaic.version = 11 : i64} {
  func.func @_concat_conv1d_kernel(%arg0: i32, %arg1: memref<8x32xf32, #tpu.memory_space<vmem>>, %arg2: memref<4x24xf32, #tpu.memory_space<vmem>>, %arg3: memref<4x1xf32, #tpu.memory_space<vmem>>, %arg4: memref<4x32xf32, #tpu.memory_space<vmem>>) attributes {dimension_semantics = [#tpu.dimension_semantics<parallel>], iteration_bounds = array<i64: 1>, scalar_prefetch = 0 : i64, scratch_operands = 0 : i64, tpu.core_type = #tpu.core_type<tc>, window_params = [{transform_indices = @transform_0, window_bounds = array<i64: 8, 32>}, {pipeline_mode = #tpu.pipeline_mode<synchronous>, transform_indices = @transform_1, window_bounds = array<i64: 4, 24>}, {pipeline_mode = #tpu.pipeline_mode<synchronous>, transform_indices = @transform_2, window_bounds = array<i64: 4, 1>}, {transform_indices = @transform_3, window_bounds = array<i64: 4, 32>}]} {
    %c0 = arith.constant 0 : index
    %c0_0 = arith.constant 0 : index
    %0 = vector.load %arg1[%c0, %c0_0] : memref<8x32xf32, #tpu.memory_space<vmem>>, vector<8x32xf32>
    %1 = vector.extract_strided_slice %0 {offsets = [0, 1], sizes = [8, 31], strides = [1, 1]} : vector<8x32xf32> to vector<8x31xf32>
    %2 = vector.extract_strided_slice %0 {offsets = [0, 0], sizes = [8, 1], strides = [1, 1]} : vector<8x32xf32> to vector<8x1xf32>
    %3 = tpu.concatenate %1, %2 in 1 : vector<8x31xf32>, vector<8x1xf32> -> vector<8x32xf32>
    %4 = vector.extract_strided_slice %0 {offsets = [0, 2], sizes = [8, 30], strides = [1, 1]} : vector<8x32xf32> to vector<8x30xf32>
    %5 = vector.extract_strided_slice %0 {offsets = [0, 0], sizes = [8, 2], strides = [1, 1]} : vector<8x32xf32> to vector<8x2xf32>
    %6 = tpu.concatenate %4, %5 in 1 : vector<8x30xf32>, vector<8x2xf32> -> vector<8x32xf32>
    %7 = tpu.concatenate %0, %3, %6 in 0 : vector<8x32xf32>, vector<8x32xf32>, vector<8x32xf32> -> vector<24x32xf32>
    %c0_1 = arith.constant 0 : index
    %c0_2 = arith.constant 0 : index
    %8 = vector.load %arg2[%c0_1, %c0_2] : memref<4x24xf32, #tpu.memory_space<vmem>>, vector<4x24xf32>
    %cst = arith.constant dense<0.000000e+00> : vector<4x32xf32>
    %9 = tpu.matmul %8, %7, %cst {dimension_numbers = #tpu.dot_dimension_numbers<[1], [0], [0], [1], [0, 0, 1, 1], [], []>} : vector<4x24xf32>, vector<24x32xf32>, vector<4x32xf32> -> vector<4x32xf32>
    %c0_3 = arith.constant 0 : index
    %c0_4 = arith.constant 0 : index
    %10 = vector.load %arg3[%c0_3, %c0_4] : memref<4x1xf32, #tpu.memory_space<vmem>>, vector<4x1xf32>
    %11 = vector.broadcast %10 : vector<4x1xf32> to vector<4x32xf32>
    %12 = arith.addf %9, %11 : vector<4x32xf32>
    %c0_5 = arith.constant 0 : index
    %c0_6 = arith.constant 0 : index
    %13 = vector.load %arg4[%c0_5, %c0_6] : memref<4x32xf32, #tpu.memory_space<vmem>>, vector<4x32xf32>
    tpu.vector_store %arg4[%c0_5, %c0_6], %12 {strides = array<i32>} : memref<4x32xf32, #tpu.memory_space<vmem>>, vector<4x32xf32>,
    return
  }
  func.func @transform_0(%arg0: i32) -> (i32, i32) {
    %c0_i32 = arith.constant 0 : i32
    %c0_i32_0 = arith.constant 0 : i32
    return %c0_i32, %arg0 : i32, i32
  }
  func.func @transform_1(%arg0: i32) -> (i32, i32) {
    %c0_i32 = arith.constant 0 : i32
    %c0_i32_0 = arith.constant 0 : i32
    %c0_i32_1 = arith.constant 0 : i32
    return %c0_i32, %c0_i32_0 : i32, i32
  }
  func.func @transform_2(%arg0: i32) -> (i32, i32) {
    %c0_i32 = arith.constant 0 : i32
    %c0_i32_0 = arith.constant 0 : i32
    %c0_i32_1 = arith.constant 0 : i32
    return %c0_i32, %c0_i32_0 : i32, i32
  }
  func.func @transform_3(%arg0: i32) -> (i32, i32) {
    %c0_i32 = arith.constant 0 : i32
    %c0_i32_0 = arith.constant 0 : i32
    return %c0_i32, %arg0 : i32, i32
  }
}

</mosaic_0001>

<bundles_post_ra>
// kernel: tpu_custom_call.1
= control target key start
LH: loop header
LB: loop body
LE: loop exit
PB: predicated region body
PF: predicated region fallthrough
CT: control target
= control target key end

     0   :  { %8 = vsyncpa [#allocation3], 0  ;;  %s279_s0 = inlined_call_operand.hbm [shape: f32[8,32], index: 0, kind: input, shape index: {}]   ;;  %s280_s1 = inlined_call_operand.vmem [shape: f32[4,24], index: 1, kind: input, shape index: {}]   ;;  %s281_s2 = inlined_call_operand.vmem [shape: f32[4,1], index: 2, kind: input, shape index: {}]   ;;  %s282_s3 = inlined_call_operand.hbm [shape: f32[4,32], index: 3, kind: output, shape index: {}]  }
   0x1   :  { %9 = vsyncpa [#allocation4], 0  ;;  %s219_s12 = smov [#allocation2]   ;;  %s171_s16 = scalar_lea.hbm %s279_s0, 128 }
   0x2   :  { %s16_s13 = sshll.u32 %s219_s12, 4  ;;  %p172_p0 = scmp.ne.s32.totalorder %s279_s0, %s171_s16  ;;  %s17_s13 = int_to_ptr.vmem [resolvable:$true] %s16_s13 }
   0x3   :  { %p175_p1 = scmp.lt.u32.totalorder %s171_s16, %s279_s0 }
   0x5   :  { %p177_p2 = pnand %p175_p1, %p172_p0 }
   0x7   :  { %180 = shalt.err (!%p177_p2)
}
   0x8   :  { %s181_s21 = scalar_lea.vmem %s17_s13, 128  ;;  %p186_p4 = scmp.lt.s32.totalorder %s17_s13, %s17_s13 }
   0x9   :  { %p182_p3 = scmp.ne.s32.totalorder %s17_s13, %s181_s21  ;;  %p187_p5 = scmp.lt.s32.totalorder %s181_s21, %s181_s21 }
   0xb   :  { %p188_p6 = por %p187_p5, %p186_p4 }
   0xd   :  { %p189_p7 = pnand %p188_p6, %p182_p3 }
   0xf   :  { %192 = shalt.err (!%p189_p7)
}
  0x10   :  { %19 = dma.hbm_to_vmem [thread:$0]  %s279_s0, 128, %s17_s13, [#allocation3]  }
  0x11   :  { %215 = dma.done.wait [#allocation3], 128  }
  0x12   :  { %216 = vsyncadd [#allocation3], 4294967168  ;;  %v220_v0 = vmov 0.0|0.0   ;;  %vm221_vm0 = vmmov 0   ;;  %v222_v1 = vmov 0.0   ;;  %v27_v2 = vld [vmem:[#allocation2] sm:$0xff] }
  0x13   :  { %157 = vmatprep.subr.bf16.mxu0 %v220_v0  ;;  %154 = vmatprep.mubr.msk.f32.mxu0 %vm221_vm0, %v222_v1  ;;  %s223_s24 = smov 127   ;;  %s224_s25 = smov 126   ;;  %v225_v3 = vmov 0   ;;  %v46_v4 = vld [vmem:[%s281_s2] sm:$0xf]  ;;  %vm35_vm1 = vcmask 252928  }
  0x14   :  { %29 = vrot.lane.b32.xlu0 %v27_v2, %s223_s24  ;;  %37 = vrot.lane.b32.xlu1 %v27_v2, %s224_s25  ;;  %s226_s26 = smov 31   ;;  %s227_s27 = smov 30   ;;  %vm43_vm2 = vcmask 244736   ;;  %v45_v11 = vld [vmem:[%s280_s1] sm:$0xf]  ;;  %vm52_vm3 = vcmask 195584  }
  0x15   :  { %170 = vset.pattern.permute.xlu0 %v225_v3  ;;  %s228_s2 = smov [#allocation5]   ;;  %vm126_vm4 = vcmask 257024  }
  0x16   :  { %s134_s4 = sshll.u32 %s228_s2, 4  ;;  %s135_s4 = int_to_ptr.vmem [resolvable:$true] %s134_s4 }
  0x17   :  { %s193_s5 = scalar_lea.vmem %s135_s4, 64  ;;  %p198_p9 = scmp.lt.s32.totalorder %s135_s4, %s135_s4 }
  0x18   :  { %32 = vrot.lane.b32.xlu0 %v27_v2, %s226_s26  ;;  %40 = vrot.lane.b32.xlu1 %v27_v2, %s227_s27  ;;  %p194_p8 = scmp.ne.s32.totalorder %s135_s4, %s193_s5  ;;  %p199_p10 = scmp.lt.s32.totalorder %s193_s5, %s193_s5 }
  0x1a   :  { %p200_p11 = por %p199_p10, %p198_p9 }
  0x1c   :  { %49 = vperm.xlu0 %170, %v46_v4   ;;  %p201_p12 = pnand %p200_p11, %p194_p8 }
  0x86   :  { %v30_v5 = vpop.permute.xlu0 %29  ;;  %v38_v6 = vpop.permute.xlu1 %37 }
  0x8a   :  { %v33_v7 = vpop.permute.xlu0 %32  ;;  %v41_v10 = vpop.permute.xlu1 %40 }
  0x8b   :  { %v36_v8 = vsel %vm35_vm1, %v30_v5, %v33_v7  ;;  %v44_v12 = vsel %vm43_vm2, %v38_v6, %v41_v10 }
  0x8c   :  { %v158_v9 = vpack.c.bf16 %v36_v8, %v27_v2 }
  0x8e   :  { %159 = vmatpush3.bf16.msra.mxu0 %v158_v9 }
  0x8f   :  { %152 = vmatprep.subr.mxu0 %v222_v1 }
  0x92   :  { %153 = vmatpush3.msra.mxu0 %v44_v12 }
  0x93   :  { %155 = vmatmul.mubr.msk.f32.vlgmr.msra.gmra.mrb[0].mxu0 %vm52_vm3, %v45_v11 }
  0x9b   :  { %v50_v13 = vpop.permute.xlu0 %49 }
 0x166   :  { %v122_v14 = vpop.f32.mrb[0].mxu0 }
 0x167   :  { %v123_v15 = vadd.f32 %v122_v14, %v50_v13  ;;  %v156_v16 = vpop.f32.mrb[1].mxu0 }
 0x169   :  { %127 = vst.msk [vmem:[#allocation5] sm:$0xf] %vm126_vm4, %v123_v15 }
 0x16a   :  { %204 = shalt.err (!%p201_p12)
}
 0x16b   :  { %s205_s7 = scalar_lea.hbm %s282_s3, 64 }
 0x16c   :  { %p206_p13 = scmp.ne.s32.totalorder %s282_s3, %s205_s7  ;;  %p209_p0 = scmp.lt.u32.totalorder %s205_s7, %s282_s3 }
 0x16e   :  { %p211_p1 = pnand %p209_p0, %p206_p13 }
 0x170   :  { %214 = shalt.err (!%p211_p1)
}
 0x171   :  { %137 = dma.vmem_to_hbm [thread:$0]  %s135_s4, 64, %s282_s3, [#allocation4]  }
 0x172   :  { %217 = dma.done.wait [#allocation4], 64  }
 0x173   :  { %218 = vsyncadd [#allocation4], 4294967232 }
 0x174   :  { %141 = vsyncpa [#allocation3], 1 }
 0x175   :  { %142 = vsyncpa [#allocation4], 1 }

</bundles_post_ra>
